<compile_context>
chip_gen: v6e
topology: v6e:2x2x1
jax: 0.10.0
libtpu: 0.0.40
codegen_flags: <defaults>
</compile_context>

<pallas_src>
import functools

import jax
import jax.numpy as jnp
from jax.experimental import pallas as pl
from jax.experimental.pallas import tpu as pltpu


def _gram_kernel(x_ref, g_ref, *, k_cols, tk, steps):
    """Accumulate one (M, tk) K-tile of the unscaled Gram matrix into g_ref (f32)."""
    s = pl.program_id(0)          # K-range split (parallel -> one shard per TC on v7x)
    k = pl.program_id(1)          # K tile within the split (reduction)

    @pl.when(k == 0)
    def _():
        g_ref[...] = jnp.zeros_like(g_ref)

    x = x_ref[...]                                           # (M, tk) feature tile
    if k_cols % tk:
        # Ragged last tile: zero the lanes beyond K (Pallas edge blocks hold garbage).
        gtile = s * steps + k
        lane = jax.lax.broadcasted_iota(jnp.int32, x.shape, 1)
        x = jnp.where(lane + gtile * tk < k_cols, x, 0)

    # x @ x.T with the transpose folded into the contraction (no XLU transpose, no temp).
    g_ref[...] += jax.lax.dot_general(
        x, x,
        dimension_numbers=(((1,), (1,)), ((), ())),
        preferred_element_type=jnp.float32)


def style_loss_forward(x_nchw, target, weight, *, cast_bf16=False):
    """Returns (output, G, loss), mirroring StyleLoss.forward and its stashed attrs.

    `target` must already be pre-scaled by `weight` (as StyleLoss.__init__ does).
    Set cast_bf16=True to stream the features as bf16 (halves HBM bytes, ~3x MXU on
    v6e/v7x for f32 inputs) at a small numerical cost; accumulation stays f32.
    """
    a, b, c, d = x_nchw.shape
    M, K = a * b, c * d
    feats = x_nchw.reshape(M, K)                 # contiguous reshape: no HBM copy
    if cast_bf16:
        feats = feats.astype(jnp.bfloat16)
    itemsize = jnp.dtype(feats.dtype).itemsize

    # ---- VMEM budgeting (generation-aware) ---------------------------------
    try:
        vmem_cap = int(pltpu.get_tpu_info().vmem_capacity_bytes)
    except Exception:
        vmem_cap = 64 << 20                      # conservative fallback
    usable = min(int(vmem_cap * 3 // 4), 100 << 20)   # ~48 MiB v7x, ~96 MiB v5e/v6e
    headroom = 4 << 20
    out_resident = 2 * M * M * 4                 # double-buffered f32 G output
    tile_budget = usable - out_resident - headroom

    # K tile: as large as the budget allows (double-buffered input), lane-aligned.
    # NOTE: this design keeps the full (M, M) Gram resident; very large M would need
    # output-block tiling instead.
    if tile_budget > 0:
        tk = max(128, (tile_budget // (2 * M * itemsize)) // 128 * 128)
    else:
        tk = 128
    if tk >= K:
        tk = K                                   # single full-width tile (no mask needed)
    tiles = pl.cdiv(K, tk)

    # Split the K range across a leading parallel axis when there is enough work:
    # on v7x each TensorCore streams half the reduction (~2x); elsewhere it is a
    # negligible-overhead serial loop over two partial Grams.
    num_splits = 2 if tiles >= 4 else 1
    if num_splits > 1 and tiles % num_splits:
        tiles2 = num_splits * pl.cdiv(tiles, num_splits)
        tk2 = pl.cdiv(pl.cdiv(K, tiles2), 128) * 128     # <= tk, still lane-aligned
        if pl.cdiv(K, tk2) % num_splits == 0:
            tk, tiles = tk2, pl.cdiv(K, tk2)
        else:
            num_splits = 1
    steps = tiles // num_splits

    vmem_bytes = 2 * M * tk * itemsize + out_resident + headroom
    vmem_limit = int(min(max(vmem_bytes, 16 << 20), usable))

    norm = float(weight) / float(M * K)          # G.div(a*b*c*d); G.mul_(weight)

    partials = pl.pallas_call(
        functools.partial(_gram_kernel, k_cols=K, tk=tk, steps=steps),
        out_shape=jax.ShapeDtypeStruct((num_splits, M, M), jnp.float32),
        grid_spec=pltpu.PrefetchScalarGridSpec(
            num_scalar_prefetch=0,
            grid=(num_splits, steps),
            in_specs=[pl.BlockSpec((M, tk), lambda s, k: (0, s * steps + k))],
            out_specs=pl.BlockSpec((None, M, M), lambda s, k: (s, 0, 0)),
        ),
        compiler_params=pltpu.CompilerParams(
            dimension_semantics=("parallel", "arbitrary"),
            vmem_limit_bytes=vmem_limit),
    )(feats)

    # Sum the K-split partials, apply the scale, and do the tiny (M, M) MSE in plain JAX
    # so the target gram never occupies kernel VMEM and the kernel stays a pure reduction.
    G = partials.sum(axis=0) * norm
    loss = jnp.mean((G - target.astype(jnp.float32)) ** 2)

    # output = input.clone(): JAX arrays are immutable, so returning the input directly
    # is semantically identical and avoids a redundant read+write of the whole tensor.
    return x_nchw, G, loss


if __name__ == "__main__":
    a, b, c, d = 2, 4, 16, 16          # small NCHW feature map
    weight = 1000.0

    key = jax.random.PRNGKey(0)
    k1, k2 = jax.random.split(key)
    x = jax.random.normal(k1, (a, b, c, d), dtype=jnp.float32)
    style = jax.random.normal(k2, (a, b, c, d), dtype=jnp.float32)

    # __init__ glue in plain JAX: target = GramMatrix()(style).detach() * weight
    sf = style.reshape(a * b, c * d)
    target = (sf @ sf.T) / float(a * b * c * d) * weight

    out, G, loss = style_loss_forward(x, target, weight)
    jax.block_until_ready((out, G, loss))

    # pure-JAX reference check
    xf = x.reshape(a * b, c * d)
    G_ref = (xf @ xf.T) / float(a * b * c * d) * weight
    loss_ref = jnp.mean((G_ref - target) ** 2)
    assert jnp.allclose(out, x)
    assert jnp.allclose(G, G_ref, rtol=1e-5, atol=1e-5)
    assert jnp.allclose(loss, loss_ref, rtol=1e-4, atol=1e-4)

    print("KERNEL_OK")
</pallas_src>

<mosaic_0001>
module attributes {stable_mosaic.version = 11 : i64} {
  func.func @_gram_kernel(%arg0: i32, %arg1: i32, %arg2: memref<8x256xf32, #tpu.memory_space<vmem>>, %arg3: memref<1x8x8xf32, #tpu.memory_space<vmem>>) attributes {dimension_semantics = [#tpu.dimension_semantics<parallel>, #tpu.dimension_semantics<arbitrary>], iteration_bounds = array<i64: 1, 1>, scalar_prefetch = 0 : i64, scratch_operands = 0 : i64, tpu.core_type = #tpu.core_type<tc>, window_params = [{transform_indices = @transform_0, window_bounds = array<i64: 8, 256>}, {transform_indices = @transform_1, window_bounds = array<i64: 1, 8, 8>}]} {
    %c0_i32 = arith.constant 0 : i32
    %0 = arith.cmpi eq, %arg1, %c0_i32 : i32
    %1 = arith.extui %0 : i1 to i32
    %c0_i32_0 = arith.constant 0 : i32
    %2 = arith.cmpi ne, %1, %c0_i32_0 : i32
    scf.if %2 {
      %cst_8 = arith.constant 0.000000e+00 : f32
      %11 = vector.broadcast %cst_8 : f32 to vector<8x8xf32>
      %c0_9 = arith.constant 0 : index
      %c0_10 = arith.constant 0 : index
      %c0_11 = arith.constant 0 : index
      %12 = vector.load %arg3[%c0_9, %c0_10, %c0_11] : memref<1x8x8xf32, #tpu.memory_space<vmem>>, vector<1x8x8xf32>
      %13 = vector.shape_cast %12 : vector<1x8x8xf32> to vector<8x8xf32>
      %14 = vector.shape_cast %11 : vector<8x8xf32> to vector<1x8x8xf32>
      tpu.vector_store %arg3[%c0_9, %c0_10, %c0_11], %14 {strides = array<i32>} : memref<1x8x8xf32, #tpu.memory_space<vmem>>, vector<1x8x8xf32>,
    } else {
    }
    %c0 = arith.constant 0 : index
    %c0_1 = arith.constant 0 : index
    %3 = vector.load %arg2[%c0, %c0_1] : memref<8x256xf32, #tpu.memory_space<vmem>>, vector<8x256xf32>
    %c0_2 = arith.constant 0 : index
    %c0_3 = arith.constant 0 : index
    %c0_4 = arith.constant 0 : index
    %4 = vector.load %arg3[%c0_2, %c0_3, %c0_4] : memref<1x8x8xf32, #tpu.memory_space<vmem>>, vector<1x8x8xf32>
    %5 = vector.shape_cast %4 : vector<1x8x8xf32> to vector<8x8xf32>
    %cst = arith.constant dense<0.000000e+00> : vector<8x8xf32>
    %6 = tpu.matmul %3, %3, %cst {dimension_numbers = #tpu.dot_dimension_numbers<[1], [1], [0], [0], [0, 0, 1, 0], [], []>} : vector<8x256xf32>, vector<8x256xf32>, vector<8x8xf32> -> vector<8x8xf32>
    %7 = arith.addf %5, %6 : vector<8x8xf32>
    %c0_5 = arith.constant 0 : index
    %c0_6 = arith.constant 0 : index
    %c0_7 = arith.constant 0 : index
    %8 = vector.load %arg3[%c0_5, %c0_6, %c0_7] : memref<1x8x8xf32, #tpu.memory_space<vmem>>, vector<1x8x8xf32>
    %9 = vector.shape_cast %8 : vector<1x8x8xf32> to vector<8x8xf32>
    %10 = vector.shape_cast %7 : vector<8x8xf32> to vector<1x8x8xf32>
    tpu.vector_store %arg3[%c0_5, %c0_6, %c0_7], %10 {strides = array<i32>} : memref<1x8x8xf32, #tpu.memory_space<vmem>>, vector<1x8x8xf32>,
    return
  }
  func.func @transform_0(%arg0: i32, %arg1: i32) -> (i32, i32) {
    %c1_i32 = arith.constant 1 : i32
    %0 = arith.muli %arg0, %c1_i32 : i32
    %1 = arith.addi %0, %arg1 : i32
    %c0_i32 = arith.constant 0 : i32
    %c0_i32_0 = arith.constant 0 : i32
    return %c0_i32, %1 : i32, i32
  }
  func.func @transform_1(%arg0: i32, %arg1: i32) -> (i32, i32, i32) {
    %c0_i32 = arith.constant 0 : i32
    %c0_i32_0 = arith.constant 0 : i32
    %c0_i32_1 = arith.constant 0 : i32
    return %arg0, %c0_i32, %c0_i32_0 : i32, i32, i32
  }
}

</mosaic_0001>

<bundles_post_ra>
// kernel: tpu_custom_call.1
= control target key start
LH: loop header
LB: loop body
LE: loop exit
PB: predicated region body
PF: predicated region fallthrough
CT: control target
= control target key end

     0   :  { %6 = vsyncpa [#allocation3], 0  ;;  %s192_s0 = inlined_call_operand.hbm [shape: f32[8,256], index: 0, kind: input, shape index: {}]   ;;  %s193_s1 = inlined_call_operand.hbm [shape: f32[1,8,8], index: 1, kind: output, shape index: {}]  }
   0x1   :  { %7 = vsyncpa [#allocation4], 0  ;;  %s171_s6 = smov [#allocation2]  }
   0x2   :  { %s18_s7 = sshll.u32 %s171_s6, 4  ;;  %s19_s7 = int_to_ptr.vmem [resolvable:$true] %s18_s7 }
   0x3   :  { %s135_s8 = scalar_lea.vmem %s19_s7, 256  ;;  %p140_p1 = scmp.lt.s32.totalorder %s19_s7, %s19_s7 }
   0x4   :  { %p136_p0 = scmp.ne.s32.totalorder %s19_s7, %s135_s8  ;;  %p141_p2 = scmp.lt.s32.totalorder %s135_s8, %s135_s8 }
   0x6   :  { %p142_p3 = por %p141_p2, %p140_p1 }
   0x8   :  { %p143_p4 = pnand %p142_p3, %p136_p0 }
   0xa   :  { %146 = shalt.err (!%p143_p4)
}
   0xb   :  { %21 = dma.hbm_to_vmem [thread:$0]  %s192_s0, 256, %s19_s7, [#allocation3]  }
   0xc   :  { %167 = dma.done.wait [#allocation3], 256  }
   0xd   :  { %168 = vsyncadd [#allocation3], 4294967040  ;;  %vm31_vm0 = vcmask 64512   ;;  %v172_v0 = vmov 0.0   ;;  %v34_v1 = vld [vmem:[#allocation2 + $0x8] sm:$0xff]  ;;  %v33_v2 = vld [vmem:[#allocation2] sm:$0xff] }
   0xe   :  { %32 = vst.msk [vmem:[#allocation5] sm:$0xff] %vm31_vm0, %v172_v0  ;;  %66 = vmatprep.subr.mxu0 %v34_v1  ;;  %100 = vmatprep.mubr.f32.mxu0 %v34_v1  ;;  %s173_s11 = smov [#allocation5]  }
   0xf   :  { %67 = vmatpush1.xpose.msra.mxu0 %v33_v2  ;;  %s115_s12 = sshll.u32 %s173_s11, 4  ;;  %s116_s12 = int_to_ptr.vmem [resolvable:$true] %s115_s12 }
  0x10   :  { %s147_s0 = scalar_lea.vmem %s116_s12, 128  ;;  %p152_p6 = scmp.lt.s32.totalorder %s116_s12, %s116_s12 }
  0x11   :  { %p148_p5 = scmp.ne.s32.totalorder %s116_s12, %s147_s0  ;;  %p153_p7 = scmp.lt.s32.totalorder %s147_s0, %s147_s0 }
  0x12   :  { %101 = vmatmul.mubr.f32.vlgmr.msra.gmra.mxu0 %v33_v2 }
  0x13   :  { %p154_p8 = por %p153_p7, %p152_p6 }
  0x15   :  { %v35_v3 = vld [vmem:[#allocation5] sm:$0xff]  ;;  %p155_p9 = pnand %p154_p8, %p148_p5 }
  0xd2   :  { %v102_v4 = vpop.f32.mrf.mxu0 }
  0xd3   :  { %v106_v5 = vadd.f32 %v102_v4, %v35_v3 }
  0xd4   :  { %v104_v6 = vpop.f32.mrf.mxu0 }
  0xd5   :  { %108 = vst.msk [vmem:[#allocation5] sm:$0xff] %vm31_vm0, %v106_v5 }
  0xd6   :  { %158 = shalt.err (!%p155_p9)
}
  0xd7   :  { %118 = dma.vmem_to_hbm [thread:$0]  %s116_s12, 128, %s193_s1, [#allocation4]  }
  0xd8   :  { %169 = dma.done.wait [#allocation4], 128  }
  0xd9   :  { %170 = vsyncadd [#allocation4], 4294967168 }
  0xda   :  { %122 = vsyncpa [#allocation3], 1 }
  0xdb   :  { %123 = vsyncpa [#allocation4], 1 }

</bundles_post_ra>
